<compile_context>
chip_gen: v5e
topology: v5e:2x2
jax: 0.10.0
libtpu: 0.0.40
codegen_flags: <defaults>
</compile_context>

<pallas_src>
import functools

import jax
import jax.numpy as jnp
import numpy as np
from jax import lax
from jax.experimental import pallas as pl
from jax.experimental.pallas import tpu as pltpu


def _round_up(x, m):
    return ((x + m - 1) // m) * m


def _partials_kernel(emb_ref, lbl_ref, cent_ref, out_ref, *,
                     margin, num_ranks, idx_bits, out_cols):
    """Per-tile, per-cluster partial sums.

    emb_ref : [tn, D] f32       (points on sublanes, D on lanes)
    lbl_ref : [1, tn] i32       (padding points carry label -1)
    cent_ref: [C, D]  f32
    out_ref : [1, C, out_cols] f32
              col 0 = count, col 1 = sum d^2 to own centroid,
              cols 2..2+K-1 = per-rank repulsion sums, rest = 0 (lane padding)
    """
    emb = emb_ref[...]                       # [tn, D]
    labels = lbl_ref[...]                    # [1, tn]
    cent = cent_ref[...]                     # [C, D]
    tn, D = emb.shape
    C = cent.shape[0]
    K = num_ranks

    # ---- pairwise squared distances, [C, tn], lane-dense over points -------
    # cross term and per-point squared norm both go through the (otherwise
    # idle) MXU; dot_general contracting dim 1 of both operands == A @ B.T.
    dn = (((1,), (1,)), ((), ()))
    neg2cent = cent * jnp.float32(-2.0)                               # tiny [C, D]
    cross2 = lax.dot_general(neg2cent, emb, dn,
                             preferred_element_type=jnp.float32)      # [C, tn] = -2 c.e
    ones_row = jnp.ones((1, D), jnp.float32)
    e2 = lax.dot_general(ones_row, emb * emb, dn,
                         preferred_element_type=jnp.float32)          # [1, tn]
    c2 = jnp.sum(cent * cent, axis=1, keepdims=True)                  # [C, 1]
    d2 = jnp.maximum(cross2 + e2 + c2, 0.0)                           # [C, tn]

    # ---- cluster membership (one-hot over the sublane/cluster axis) --------
    row = lax.broadcasted_iota(jnp.int32, (C, tn), 0)                 # [C, tn]
    member = labels == row                                            # pad(-1) never matches
    member_f = member.astype(jnp.float32)

    counts_part = jnp.sum(member_f, axis=1, keepdims=True)            # [C, 1]
    att_part = jnp.sum(member_f * d2, axis=1, keepdims=True)          # [C, 1]

    # ---- repulsion: iterative k-smallest over the other centroids ----------
    # Selection runs on d^2 (sqrt monotone); centroid index packed into the
    # low mantissa bits of the non-negative d^2 so a single integer min per
    # rank both selects the value and pinpoints the exact entry to remove
    # (identical tie-break semantics to torch.topk: distinct indices).
    rep_cols = []
    if K > 0:
        BIG = jnp.float32(1e30)                # safe: K <= C-1 so never selected
        INT_BIG = jnp.int32(2 ** 31 - 1)
        margin_f = jnp.float32(margin)
        clear = jnp.int32(~((1 << idx_bits) - 1))
        d2_other = jnp.where(member, BIG, d2)                         # mask own centroid
        key = (pltpu.bitcast(d2_other, jnp.int32) & clear) | row      # [C, tn] i32
        # TODO(synk): for very large K (=C-1), switch to lax.fori_loop with a
        # small [C, K] VMEM scratch to bound code size / vreg pressure.
        for j in range(K):                     # short static loop, fully unrolled
            kmin = jnp.min(key, axis=0, keepdims=True)                # [1, tn] int min
            d_sel = jnp.sqrt(pltpu.bitcast(kmin & clear, jnp.float32))
            contrib = (margin_f - d_sel) ** 2   # relu((m-d)^2) == (m-d)^2
            rep_cols.append(jnp.sum(member_f * contrib, axis=1, keepdims=True))
            if j + 1 < K:
                key = jnp.where(key == kmin, INT_BIG, key)            # remove exactly one

    # ---- pack [count | att | rep_0..rep_{K-1} | 0...] into a (C, 128) slab --
    col = lax.broadcasted_iota(jnp.int32, (1, out_cols), 1)           # [1, out_cols]
    packed = (counts_part * (col == 0).astype(jnp.float32) +
              att_part * (col == 1).astype(jnp.float32))
    for j, rc in enumerate(rep_cols):
        packed = packed + rc * (col == (2 + j)).astype(jnp.float32)
    out_ref[0] = packed


def distance_centroid_loss(embeddings, cluster_labels, centroids, *,
                           margin_between_clusters,
                           number_centroids_repulsion=None,
                           tile_n=2048):
    """Pallas implementation of DistanceCentroidLoss.forward (logger ignored)."""
    N, D = embeddings.shape
    C = centroids.shape[0]

    # Static upper bound on the number of repulsion ranks.
    if number_centroids_repulsion is None:
        K = C - 1
    else:
        K = min(C - 1, int(number_centroids_repulsion))
    K = max(K, 0)
    out_cols = max(_round_up(2 + K, 128), 128)      # lane-dense output slab
    idx_bits = max(1, (C - 1).bit_length())         # bits stolen from d^2 mantissa

    # Tile N: big 128-aligned tiles to amortize grid-step overhead, but split
    # into >= 2 tiles when possible so v7x's two TensorCores both get work.
    tn = _round_up(min(int(tile_n), max(N, 1)), 128)
    T = -(-N // tn)
    if T == 1 and N > 128:
        tn = _round_up(-(-N // 2), 128)
        T = -(-N // tn)
    n_pad = T * tn

    emb_in = embeddings.astype(jnp.float32)                          # [N, D] (no transpose)
    lbl_in = cluster_labels.reshape(1, N).astype(jnp.int32)          # [1, N]
    if n_pad != N:
        emb_in = jnp.pad(emb_in, ((0, n_pad - N), (0, 0)))
        lbl_in = jnp.pad(lbl_in, ((0, 0), (0, n_pad - N)), constant_values=-1)
    cent = centroids.astype(jnp.float32)                             # [C, D]

    kernel = functools.partial(_partials_kernel,
                               margin=float(margin_between_clusters),
                               num_ranks=K, idx_bits=idx_bits, out_cols=out_cols)

    # VMEM budget: double-buffered inputs + ~a dozen [C, tn] live temporaries.
    # Stays far below the v7x 64 MiB/TC ceiling; cap the scoped limit at 48 MiB.
    vmem_est = (4 * tn * D * 4) + (16 * C * tn * 4) + (4 * C * out_cols * 4)
    vmem_limit = int(min(max(32 * 1024 * 1024, 2 * vmem_est), 48 * 1024 * 1024))

    parts = pl.pallas_call(
        kernel,
        out_shape=jax.ShapeDtypeStruct((T, C, out_cols), jnp.float32),
        grid=(T,),
        in_specs=[
            pl.BlockSpec((tn, D), lambda i: (i, 0)),     # embeddings [N, D] tiles
            pl.BlockSpec((1, tn), lambda i: (0, i)),     # labels (lane-dense row)
            pl.BlockSpec((C, D), lambda i: (0, 0)),      # centroids (resident)
        ],
        out_specs=pl.BlockSpec((1, C, out_cols), lambda i: (i, 0, 0)),
        compiler_params=pltpu.CompilerParams(
            dimension_semantics=("parallel",),
            vmem_limit_bytes=vmem_limit),
    )(emb_in, lbl_in, cent)

    # ---- tiny O(C*K) finalize in plain JAX (keeps the grid axis parallel) ---
    sums = jnp.sum(parts, axis=0)                 # [C, out_cols]
    counts = sums[:, 0]                           # [C]
    att_sums = sums[:, 1]                         # [C]
    present = counts > 0.0
    num_unique = jnp.sum(present.astype(jnp.float32))
    num_unique_i = num_unique.astype(jnp.int32)
    inv_counts = jnp.where(present, 1.0 / jnp.maximum(counts, 1.0), 0.0)

    attraction = jnp.sum(att_sums * inv_counts)

    if number_centroids_repulsion is None:
        k_dyn = num_unique_i - 1
    else:
        k_dyn = jnp.minimum(num_unique_i - 1, jnp.int32(number_centroids_repulsion))

    if K > 0:
        rep_rank_sums = sums[:, 2:2 + K]          # [C, K]
        rank_mask = (jnp.arange(K, dtype=jnp.int32)[None, :] < k_dyn).astype(jnp.float32)
        per_cluster = jnp.sum(rep_rank_sums * rank_mask, axis=1)
        k_f = jnp.maximum(k_dyn.astype(jnp.float32), 1.0)
        repulsion = jnp.where(num_unique_i > 1,
                              jnp.sum(per_cluster * inv_counts) / k_f,
                              0.0)
    else:
        repulsion = jnp.float32(0.0)

    # Guard the empty-batch case (PyTorch would divide by zero here).
    total = (attraction + repulsion) / jnp.maximum(num_unique, 1.0)
    # TODO(synk): logger-side metrics (centroid distance stats, intra-cluster
    # distance) are logging-only in the PyTorch module and are not computed here.
    return jnp.where(num_unique > 0.0, total, jnp.float32(0.0))


def _reference_loss(emb, labels, cent, margin, k_cfg):
    """Pure numpy transcription of the PyTorch forward (for verification)."""
    emb = np.asarray(emb, np.float64)
    cent = np.asarray(cent, np.float64)
    labels = np.asarray(labels)
    uniq = np.unique(labels)
    U = len(uniq)
    attraction = 0.0
    repulsion = 0.0
    for i in uniq:
        pts = emb[labels == i]
        cc = cent[i:i + 1]
        others = np.concatenate([cent[:i], cent[i + 1:]], axis=0)
        ad = np.linalg.norm(pts - cc, axis=1)
        attraction += np.mean(ad ** 2)
        if U > 1:
            rd = np.linalg.norm(pts[:, None, :] - others[None, :, :], axis=2)
            k = U - 1 if k_cfg is None else min(U - 1, k_cfg)
            closest = np.sort(rd, axis=1)[:, :k]
            repulsion += np.mean(np.maximum((margin - closest) ** 2, 0.0))
    return (attraction + repulsion) / U


if __name__ == "__main__":
    # Module config (deterministic, set in-script).
    margin_between_clusters = 5.0
    number_centroids_repulsion = 3

    key = jax.random.PRNGKey(0)
    k1, k2, k3 = jax.random.split(key, 3)
    N, D, C = 64, 32, 8
    embeddings = jax.random.normal(k1, (N, D), jnp.float32)
    centroids = jax.random.normal(k2, (C, D), jnp.float32) * 2.0
    # only 6 of the 8 centroids appear in the batch (exercises the "unique" path)
    cluster_labels = jax.random.randint(k3, (N,), 0, 6, dtype=jnp.int32)

    loss_fn = jax.jit(functools.partial(
        distance_centroid_loss,
        margin_between_clusters=margin_between_clusters,
        number_centroids_repulsion=number_centroids_repulsion))

    loss = jax.block_until_ready(loss_fn(embeddings, cluster_labels, centroids))

    ref = _reference_loss(embeddings, cluster_labels, centroids,
                          margin_between_clusters, number_centroids_repulsion)
    assert abs(float(loss) - float(ref)) <= 1e-3 * max(1.0, abs(float(ref))), \
        (float(loss), float(ref))
    print("KERNEL_OK")
</pallas_src>

<mosaic_0001>
module attributes {stable_mosaic.version = 11 : i64} {
  func.func @_partials_kernel(%arg0: i32, %arg1: memref<128x32xf32, #tpu.memory_space<vmem>>, %arg2: memref<1x128xi32, #tpu.memory_space<vmem>>, %arg3: memref<8x32xf32, #tpu.memory_space<vmem>>, %arg4: memref<1x8x128xf32, #tpu.memory_space<vmem>>) attributes {dimension_semantics = [#tpu.dimension_semantics<parallel>], iteration_bounds = array<i64: 1>, scalar_prefetch = 0 : i64, scratch_operands = 0 : i64, tpu.core_type = #tpu.core_type<tc>, window_params = [{transform_indices = @transform_0, window_bounds = array<i64: 128, 32>}, {transform_indices = @transform_1, window_bounds = array<i64: 1, 128>}, {pipeline_mode = #tpu.pipeline_mode<synchronous>, transform_indices = @transform_2, window_bounds = array<i64: 8, 32>}, {transform_indices = @transform_3, window_bounds = array<i64: 1, 8, 128>}]} {
    %c0 = arith.constant 0 : index
    %c0_0 = arith.constant 0 : index
    %0 = vector.load %arg1[%c0, %c0_0] : memref<128x32xf32, #tpu.memory_space<vmem>>, vector<128x32xf32>
    %c0_1 = arith.constant 0 : index
    %c0_2 = arith.constant 0 : index
    %1 = vector.load %arg2[%c0_1, %c0_2] : memref<1x128xi32, #tpu.memory_space<vmem>>, vector<1x128xi32>
    %c0_3 = arith.constant 0 : index
    %c0_4 = arith.constant 0 : index
    %2 = vector.load %arg3[%c0_3, %c0_4] : memref<8x32xf32, #tpu.memory_space<vmem>>, vector<8x32xf32>
    %cst = arith.constant -2.000000e+00 : f32
    %3 = vector.broadcast %cst : f32 to vector<8x32xf32>
    %4 = arith.mulf %2, %3 : vector<8x32xf32>
    %cst_5 = arith.constant dense<0.000000e+00> : vector<8x128xf32>
    %5 = tpu.matmul %4, %0, %cst_5 {dimension_numbers = #tpu.dot_dimension_numbers<[1], [1], [0], [0], [0, 0, 1, 0], [], []>} : vector<8x32xf32>, vector<128x32xf32>, vector<8x128xf32> -> vector<8x128xf32>
    %cst_6 = arith.constant 1.000000e+00 : f32
    %6 = vector.broadcast %cst_6 : f32 to vector<1x32xf32>
    %7 = arith.mulf %0, %0 : vector<128x32xf32>
    %cst_7 = arith.constant dense<0.000000e+00> : vector<1x128xf32>
    %8 = tpu.matmul %6, %7, %cst_7 {dimension_numbers = #tpu.dot_dimension_numbers<[1], [1], [0], [0], [0, 0, 1, 0], [], []>} : vector<1x32xf32>, vector<128x32xf32>, vector<1x128xf32> -> vector<1x128xf32>
    %9 = arith.mulf %2, %2 : vector<8x32xf32>
    %cst_8 = arith.constant dense<0.000000e+00> : vector<8xf32>
    %10 = vector.multi_reduction <add>, %9, %cst_8 [1] : vector<8x32xf32> to vector<8xf32>
    %11 = vector.shape_cast %10 : vector<8xf32> to vector<8x1xf32>
    %12 = vector.broadcast %8 : vector<1x128xf32> to vector<8x128xf32>
    %13 = arith.addf %5, %12 : vector<8x128xf32>
    %14 = vector.broadcast %11 : vector<8x1xf32> to vector<8x128xf32>
    %15 = arith.addf %13, %14 : vector<8x128xf32>
    %cst_9 = arith.constant 0.000000e+00 : f32
    %16 = vector.broadcast %cst_9 : f32 to vector<8x128xf32>
    %17 = arith.maximumf %15, %16 : vector<8x128xf32>
    %18 = tpu.iota {dimensions = array<i32: 0>} : vector<8x128xi32>
    %19 = vector.broadcast %1 : vector<1x128xi32> to vector<8x128xi32>
    %20 = arith.cmpi eq, %19, %18 : vector<8x128xi32>
    %21 = arith.extui %20 : vector<8x128xi1> to vector<8x128xi32>
    %22 = arith.sitofp %21 : vector<8x128xi32> to vector<8x128xf32>
    %cst_10 = arith.constant dense<0.000000e+00> : vector<8xf32>
    %23 = vector.multi_reduction <add>, %22, %cst_10 [1] : vector<8x128xf32> to vector<8xf32>
    %24 = vector.shape_cast %23 : vector<8xf32> to vector<8x1xf32>
    %25 = arith.mulf %22, %17 : vector<8x128xf32>
    %cst_11 = arith.constant dense<0.000000e+00> : vector<8xf32>
    %26 = vector.multi_reduction <add>, %25, %cst_11 [1] : vector<8x128xf32> to vector<8xf32>
    %27 = vector.shape_cast %26 : vector<8xf32> to vector<8x1xf32>
    %cst_12 = arith.constant 1.000000e+30 : f32
    %28 = vector.broadcast %cst_12 : f32 to vector<8x128xf32>
    %29 = arith.select %20, %28, %17 : vector<8x128xi1>, vector<8x128xf32>
    %30 = tpu.bitcast %29 : vector<8x128xf32> -> vector<8x128xi32>
    %c-8_i32 = arith.constant -8 : i32
    %31 = vector.broadcast %c-8_i32 : i32 to vector<8x128xi32>
    %32 = arith.andi %30, %31 : vector<8x128xi32>
    %33 = arith.ori %32, %18 : vector<8x128xi32>
    %cst_13 = arith.constant dense<2147483647> : vector<128xi32>
    %34 = vector.multi_reduction <minsi>, %33, %cst_13 [0] : vector<8x128xi32> to vector<128xi32>
    %35 = vector.shape_cast %34 : vector<128xi32> to vector<1x128xi32>
    %c-8_i32_14 = arith.constant -8 : i32
    %36 = vector.broadcast %c-8_i32_14 : i32 to vector<1x128xi32>
    %37 = arith.andi %35, %36 : vector<1x128xi32>
    %38 = tpu.bitcast %37 : vector<1x128xi32> -> vector<1x128xf32>
    %39 = math.sqrt %38 : vector<1x128xf32>
    %cst_15 = arith.constant 5.000000e+00 : f32
    %40 = vector.broadcast %cst_15 : f32 to vector<1x128xf32>
    %41 = arith.subf %40, %39 : vector<1x128xf32>
    %42 = arith.mulf %41, %41 : vector<1x128xf32>
    %43 = vector.broadcast %42 : vector<1x128xf32> to vector<8x128xf32>
    %44 = arith.mulf %22, %43 : vector<8x128xf32>
    %cst_16 = arith.constant dense<0.000000e+00> : vector<8xf32>
    %45 = vector.multi_reduction <add>, %44, %cst_16 [1] : vector<8x128xf32> to vector<8xf32>
    %46 = vector.shape_cast %45 : vector<8xf32> to vector<8x1xf32>
    %47 = vector.broadcast %35 : vector<1x128xi32> to vector<8x128xi32>
    %48 = arith.cmpi eq, %33, %47 : vector<8x128xi32>
    %c2147483647_i32 = arith.constant 2147483647 : i32
    %49 = vector.broadcast %c2147483647_i32 : i32 to vector<8x128xi32>
    %50 = arith.select %48, %49, %33 : vector<8x128xi1>, vector<8x128xi32>
    %cst_17 = arith.constant dense<2147483647> : vector<128xi32>
    %51 = vector.multi_reduction <minsi>, %50, %cst_17 [0] : vector<8x128xi32> to vector<128xi32>
    %52 = vector.shape_cast %51 : vector<128xi32> to vector<1x128xi32>
    %c-8_i32_18 = arith.constant -8 : i32
    %53 = vector.broadcast %c-8_i32_18 : i32 to vector<1x128xi32>
    %54 = arith.andi %52, %53 : vector<1x128xi32>
    %55 = tpu.bitcast %54 : vector<1x128xi32> -> vector<1x128xf32>
    %56 = math.sqrt %55 : vector<1x128xf32>
    %cst_19 = arith.constant 5.000000e+00 : f32
    %57 = vector.broadcast %cst_19 : f32 to vector<1x128xf32>
    %58 = arith.subf %57, %56 : vector<1x128xf32>
    %59 = arith.mulf %58, %58 : vector<1x128xf32>
    %60 = vector.broadcast %59 : vector<1x128xf32> to vector<8x128xf32>
    %61 = arith.mulf %22, %60 : vector<8x128xf32>
    %cst_20 = arith.constant dense<0.000000e+00> : vector<8xf32>
    %62 = vector.multi_reduction <add>, %61, %cst_20 [1] : vector<8x128xf32> to vector<8xf32>
    %63 = vector.shape_cast %62 : vector<8xf32> to vector<8x1xf32>
    %64 = vector.broadcast %52 : vector<1x128xi32> to vector<8x128xi32>
    %65 = arith.cmpi eq, %50, %64 : vector<8x128xi32>
    %c2147483647_i32_21 = arith.constant 2147483647 : i32
    %66 = vector.broadcast %c2147483647_i32_21 : i32 to vector<8x128xi32>
    %67 = arith.select %65, %66, %50 : vector<8x128xi1>, vector<8x128xi32>
    %cst_22 = arith.constant dense<2147483647> : vector<128xi32>
    %68 = vector.multi_reduction <minsi>, %67, %cst_22 [0] : vector<8x128xi32> to vector<128xi32>
    %69 = vector.shape_cast %68 : vector<128xi32> to vector<1x128xi32>
    %c-8_i32_23 = arith.constant -8 : i32
    %70 = vector.broadcast %c-8_i32_23 : i32 to vector<1x128xi32>
    %71 = arith.andi %69, %70 : vector<1x128xi32>
    %72 = tpu.bitcast %71 : vector<1x128xi32> -> vector<1x128xf32>
    %73 = math.sqrt %72 : vector<1x128xf32>
    %cst_24 = arith.constant 5.000000e+00 : f32
    %74 = vector.broadcast %cst_24 : f32 to vector<1x128xf32>
    %75 = arith.subf %74, %73 : vector<1x128xf32>
    %76 = arith.mulf %75, %75 : vector<1x128xf32>
    %77 = vector.broadcast %76 : vector<1x128xf32> to vector<8x128xf32>
    %78 = arith.mulf %22, %77 : vector<8x128xf32>
    %cst_25 = arith.constant dense<0.000000e+00> : vector<8xf32>
    %79 = vector.multi_reduction <add>, %78, %cst_25 [1] : vector<8x128xf32> to vector<8xf32>
    %80 = vector.shape_cast %79 : vector<8xf32> to vector<8x1xf32>
    %81 = tpu.iota {dimensions = array<i32: 1>} : vector<1x128xi32>
    %c0_i32 = arith.constant 0 : i32
    %82 = vector.broadcast %c0_i32 : i32 to vector<1x128xi32>
    %83 = arith.cmpi eq, %81, %82 : vector<1x128xi32>
    %84 = arith.extui %83 : vector<1x128xi1> to vector<1x128xi32>
    %85 = arith.sitofp %84 : vector<1x128xi32> to vector<1x128xf32>
    %86 = vector.broadcast %24 : vector<8x1xf32> to vector<8x128xf32>
    %87 = vector.broadcast %85 : vector<1x128xf32> to vector<8x128xf32>
    %88 = arith.mulf %86, %87 : vector<8x128xf32>
    %c1_i32 = arith.constant 1 : i32
    %89 = vector.broadcast %c1_i32 : i32 to vector<1x128xi32>
    %90 = arith.cmpi eq, %81, %89 : vector<1x128xi32>
    %91 = arith.extui %90 : vector<1x128xi1> to vector<1x128xi32>
    %92 = arith.sitofp %91 : vector<1x128xi32> to vector<1x128xf32>
    %93 = vector.broadcast %27 : vector<8x1xf32> to vector<8x128xf32>
    %94 = vector.broadcast %92 : vector<1x128xf32> to vector<8x128xf32>
    %95 = arith.mulf %93, %94 : vector<8x128xf32>
    %96 = arith.addf %88, %95 : vector<8x128xf32>
    %c2_i32 = arith.constant 2 : i32
    %97 = vector.broadcast %c2_i32 : i32 to vector<1x128xi32>
    %98 = arith.cmpi eq, %81, %97 : vector<1x128xi32>
    %99 = arith.extui %98 : vector<1x128xi1> to vector<1x128xi32>
    %100 = arith.sitofp %99 : vector<1x128xi32> to vector<1x128xf32>
    %101 = vector.broadcast %46 : vector<8x1xf32> to vector<8x128xf32>
    %102 = vector.broadcast %100 : vector<1x128xf32> to vector<8x128xf32>
    %103 = arith.mulf %101, %102 : vector<8x128xf32>
    %104 = arith.addf %96, %103 : vector<8x128xf32>
    %c3_i32 = arith.constant 3 : i32
    %105 = vector.broadcast %c3_i32 : i32 to vector<1x128xi32>
    %106 = arith.cmpi eq, %81, %105 : vector<1x128xi32>
    %107 = arith.extui %106 : vector<1x128xi1> to vector<1x128xi32>
    %108 = arith.sitofp %107 : vector<1x128xi32> to vector<1x128xf32>
    %109 = vector.broadcast %63 : vector<8x1xf32> to vector<8x128xf32>
    %110 = vector.broadcast %108 : vector<1x128xf32> to vector<8x128xf32>
    %111 = arith.mulf %109, %110 : vector<8x128xf32>
    %112 = arith.addf %104, %111 : vector<8x128xf32>
    %c4_i32 = arith.constant 4 : i32
    %113 = vector.broadcast %c4_i32 : i32 to vector<1x128xi32>
    %114 = arith.cmpi eq, %81, %113 : vector<1x128xi32>
    %115 = arith.extui %114 : vector<1x128xi1> to vector<1x128xi32>
    %116 = arith.sitofp %115 : vector<1x128xi32> to vector<1x128xf32>
    %117 = vector.broadcast %80 : vector<8x1xf32> to vector<8x128xf32>
    %118 = vector.broadcast %116 : vector<1x128xf32> to vector<8x128xf32>
    %119 = arith.mulf %117, %118 : vector<8x128xf32>
    %120 = arith.addf %112, %119 : vector<8x128xf32>
    %c0_26 = arith.constant 0 : index
    %c0_27 = arith.constant 0 : index
    %c0_28 = arith.constant 0 : index
    %121 = vector.load %arg4[%c0_26, %c0_27, %c0_28] : memref<1x8x128xf32, #tpu.memory_space<vmem>>, vector<1x8x128xf32>
    %122 = vector.shape_cast %121 : vector<1x8x128xf32> to vector<8x128xf32>
    %123 = vector.shape_cast %120 : vector<8x128xf32> to vector<1x8x128xf32>
    tpu.vector_store %arg4[%c0_26, %c0_27, %c0_28], %123 {strides = array<i32>} : memref<1x8x128xf32, #tpu.memory_space<vmem>>, vector<1x8x128xf32>,
    return
  }
  func.func @transform_0(%arg0: i32) -> (i32, i32) {
    %c0_i32 = arith.constant 0 : i32
    %c0_i32_0 = arith.constant 0 : i32
    return %arg0, %c0_i32 : i32, i32
  }
  func.func @transform_1(%arg0: i32) -> (i32, i32) {
    %c0_i32 = arith.constant 0 : i32
    %c0_i32_0 = arith.constant 0 : i32
    return %c0_i32, %arg0 : i32, i32
  }
  func.func @transform_2(%arg0: i32) -> (i32, i32) {
    %c0_i32 = arith.constant 0 : i32
    %c0_i32_0 = arith.constant 0 : i32
    %c0_i32_1 = arith.constant 0 : i32
    return %c0_i32, %c0_i32_0 : i32, i32
  }
  func.func @transform_3(%arg0: i32) -> (i32, i32, i32) {
    %c0_i32 = arith.constant 0 : i32
    %c0_i32_0 = arith.constant 0 : i32
    %c0_i32_1 = arith.constant 0 : i32
    return %arg0, %c0_i32, %c0_i32_0 : i32, i32, i32
  }
}

</mosaic_0001>

<bundles_post_ra>
// kernel: distance_centroid_loss.1
= control target key start
LH: loop header
LB: loop body
LE: loop exit
PB: predicated region body
PF: predicated region fallthrough
CT: control target
= control target key end

     0   :  { %vm49_vm0 = vcmask 261120   ;;  %v382_v36 = vmov 1.0   ;;  %v199_v37 = vlaneseq  ;;  %v383_v40 = vmov 0.0   ;;  %s511_s0 = inlined_call_operand.vmem [shape: f32[128,32], index: 0, kind: input, shape index: {}]   ;;  %s512_s2 = inlined_call_operand.vmem [shape: f32[8,32], index: 2, kind: input, shape index: {}]   ;;  %s513_s1 = inlined_call_operand.vmem [shape: s32[1,128], index: 1, kind: input, shape index: {}]   ;;  %s514_s3 = inlined_call_operand.vmem [shape: f32[1,8,128], index: 3, kind: output, shape index: {}]  }
   0x1   :  { %v29_v0 = vld [vmem:[%s511_s0 + $0x78] sm:$0xff]  ;;  %v28_v1 = vld [vmem:[%s511_s0 + $0x70] sm:$0xff]  ;;  %v27_v4 = vld [vmem:[%s511_s0 + $0x68] sm:$0xff] }
   0x2   :  { %v48_v2 = vmul.f32 %v29_v0, %v29_v0  ;;  %350 = vmatpush.xpose.msk.msra.mxu1 %vm49_vm0, %v29_v0  ;;  %v47_v3 = vmul.f32 %v28_v1, %v28_v1  ;;  %v46_v5 = vmul.f32 %v27_v4, %v27_v4  ;;  %v26_v6 = vld [vmem:[%s511_s0 + $0x60] sm:$0xff]  ;;  %v25_v8 = vld [vmem:[%s511_s0 + $0x58] sm:$0xff]  ;;  %v24_v10 = vld [vmem:[%s511_s0 + $0x50] sm:$0xff]  ;;  %v200_v38 = vshrl.u32 %v199_v37, 7 }
   0x3   :  { %v45_v7 = vmul.f32 %v26_v6, %v26_v6  ;;  %v44_v9 = vmul.f32 %v25_v8, %v25_v8  ;;  %v43_v11 = vmul.f32 %v24_v10, %v24_v10  ;;  %v23_v12 = vld [vmem:[%s511_s0 + $0x48] sm:$0xff]  ;;  %v22_v14 = vld [vmem:[%s511_s0 + $0x40] sm:$0xff]  ;;  %v21_v16 = vld [vmem:[%s511_s0 + $0x38] sm:$0xff] }
   0x4   :  { %333 = vmatpush.xpose.msk.msra.mxu0 %vm49_vm0, %v48_v2  ;;  %v42_v13 = vmul.f32 %v23_v12, %v23_v12  ;;  %v41_v15 = vmul.f32 %v22_v14, %v22_v14  ;;  %v40_v17 = vmul.f32 %v21_v16, %v21_v16  ;;  %v20_v18 = vld [vmem:[%s511_s0 + $0x30] sm:$0xff]  ;;  %v31_v19 = vld [vmem:[%s512_s2] sm:$0xff]  ;;  %v19_v22 = vld [vmem:[%s511_s0 + $0x28] sm:$0xff] }
   0x5   :  { %v121_v20 = vmul.f32 %v31_v19, %v31_v19  ;;  %v39_v21 = vmul.f32 %v20_v18, %v20_v18  ;;  %v38_v24 = vmul.f32 %v19_v22, %v19_v22  ;;  %v18_v25 = vld [vmem:[%s511_s0 + $0x20] sm:$0xff]  ;;  %v17_v27 = vld [vmem:[%s511_s0 + $0x18] sm:$0xff]  ;;  %v16_v29 = vld [vmem:[%s511_s0 + $0x10] sm:$0xff]  ;;  %v32_v35 = vmul.f32 -2.0, %v31_v19 }
   0x6   :  { %351 = vmatpush.xpose.msk.msra.mxu1 %vm49_vm0, %v28_v1  ;;  %v37_v26 = vmul.f32 %v18_v25, %v18_v25  ;;  %v36_v28 = vmul.f32 %v17_v27, %v17_v27  ;;  %v35_v30 = vmul.f32 %v16_v29, %v16_v29  ;;  %v15_v31 = vld [vmem:[%s511_s0 + $0x8] sm:$0xff]  ;;  %v14_v33 = vld [vmem:[%s511_s0] sm:$0xff] }
   0x7   :  { %v122_v23 = vsel %vm49_vm0, %v121_v20, 0.0  ;;  %v34_v32 = vmul.f32 %v15_v31, %v15_v31  ;;  %v33_v34 = vmul.f32 %v14_v33, %v14_v33  ;;  %v375_v39 = vld [vmem:[%s513_s1] ss:$0 sm:$0xff] }
   0x8   :  { %334 = vmatpush.xpose.msk.msra.mxu0 %vm49_vm0, %v47_v3  ;;  %123 = vadd.xlane.f32.xlu0 %v122_v23  ;;  %vm202_vm1 = vcmp.eq.s32.totalorder %v375_v39, %v200_v38 }
   0x9   :  { %v495_v41 = vsel %vm202_vm1, 1.0, %v383_v40 }
   0xa   :  { %352 = vmatpush.xpose.msk.msra.mxu1 %vm49_vm0, %v27_v4 }
   0xc   :  { %335 = vmatpush.xpose.msk.msra.mxu0 %vm49_vm0, %v46_v5 }
   0xe   :  { %353 = vmatpush.xpose.msk.msra.mxu1 %vm49_vm0, %v26_v6 }
  0x10   :  { %336 = vmatpush.xpose.msk.msra.mxu0 %vm49_vm0, %v45_v7  ;;  %205 = vadd.xlane.f32.xlu0 %v495_v41 }
  0x12   :  { %354 = vmatpush.xpose.msk.msra.mxu1 %vm49_vm0, %v25_v8 }
  0x14   :  { %337 = vmatpush.xpose.msk.msra.mxu0 %vm49_vm0, %v44_v9 }
  0x16   :  { %355 = vmatpush.xpose.msk.msra.mxu1 %vm49_vm0, %v24_v10 }
  0x18   :  { %338 = vmatpush.xpose.msk.msra.mxu0 %vm49_vm0, %v43_v11 }
  0x1a   :  { %356 = vmatpush.xpose.msk.msra.mxu1 %vm49_vm0, %v23_v12 }
  0x1c   :  { %339 = vmatpush.xpose.msk.msra.mxu0 %vm49_vm0, %v42_v13 }
  0x1e   :  { %357 = vmatpush.xpose.msk.msra.mxu1 %vm49_vm0, %v22_v14 }
  0x20   :  { %340 = vmatpush.xpose.msk.msra.mxu0 %vm49_vm0, %v41_v15 }
  0x22   :  { %358 = vmatpush.xpose.msk.msra.mxu1 %vm49_vm0, %v21_v16 }
  0x24   :  { %341 = vmatpush.xpose.msk.msra.mxu0 %vm49_vm0, %v40_v17 }
  0x26   :  { %359 = vmatpush.xpose.msk.msra.mxu1 %vm49_vm0, %v20_v18 }
  0x28   :  { %342 = vmatpush.xpose.msk.msra.mxu0 %vm49_vm0, %v39_v21 }
  0x2a   :  { %360 = vmatpush.xpose.msk.msra.mxu1 %vm49_vm0, %v19_v22 }
  0x2c   :  { %343 = vmatpush.xpose.msk.msra.mxu0 %vm49_vm0, %v38_v24 }
  0x2e   :  { %361 = vmatpush.xpose.msk.msra.mxu1 %vm49_vm0, %v18_v25 }
  0x30   :  { %344 = vmatpush.xpose.msk.msra.mxu0 %vm49_vm0, %v37_v26 }
  0x32   :  { %362 = vmatpush.xpose.msk.msra.mxu1 %vm49_vm0, %v17_v27 }
  0x34   :  { %345 = vmatpush.xpose.msk.msra.mxu0 %vm49_vm0, %v36_v28 }
  0x36   :  { %363 = vmatpush.xpose.msk.msra.mxu1 %vm49_vm0, %v16_v29 }
  0x38   :  { %346 = vmatpush.xpose.msk.msra.mxu0 %vm49_vm0, %v35_v30 }
  0x3a   :  { %364 = vmatpush.xpose.msk.msra.mxu1 %vm49_vm0, %v15_v31 }
  0x3c   :  { %347 = vmatpush.xpose.msk.msra.mxu0 %vm49_vm0, %v34_v32 }
  0x3e   :  { %365 = vmatpush.xpose.msk.msra.mxu1 %vm49_vm0, %v14_v33 }
  0x40   :  { %348 = vmatpush.xpose.msk.msra.mxu0 %vm49_vm0, %v33_v34 }
  0x41   :  { %366 = vmatmul.msk.f32.vlgmr.msra.gmra.mxu1 %vm49_vm0, %v32_v35 }
  0x43   :  { %349 = vmatmul.msk.f32.vlgmr.msra.gmra.mxu0 %vm49_vm0, %v382_v36 }
  0x7b   :  { %v124_v45 = vpop.xlane.xlu0 %123 }
  0xbe   :  { %v194_v43 = vpop.f32.mrf.mxu1 }
  0xc0   :  { %v118_v42 = vpop.f32.mrf.mxu0 }
  0xc1   :  { %v125_v44 = vperm.slane %v118_v42, 0 }
  0xc3   :  { %v195_v46 = vadd.f32 %v194_v43, %v125_v44 }
  0xc5   :  { %v197_v47 = vadd.f32 %v195_v46, %v124_v45 }
  0xc7   :  { %v198_v48 = vmax.f32 %v197_v47, 0.0 }
  0xc9   :  { %v210_v49 = vsel %vm202_vm1, 1e+30, %v198_v48  ;;  %v207_v50 = vmul.f32 %v495_v41, %v198_v48 }
  0xca   :  { %v212_v51 = vand.u32 4294967288, %v210_v49 }
  0xcb   :  { %208 = vadd.xlane.f32.xlu1 %v207_v50 }
  0xcc   :  { %v213_v52 = vor.u32 %v212_v51, %v200_v38 }
  0xce   :  { %v214_v53 = vrot.slane %v213_v52, 4 }
  0xd0   :  { %vm215_vm2 = vcmp.lt.s32.totalorder %v213_v52, %v214_v53 }
  0xd1   :  { %v216_v54 = vsel %vm215_vm2, %v213_v52, %v214_v53 }
  0xd2   :  { %v217_v55 = vrot.slane %v216_v54, 2 }
  0xd4   :  { %vm218_vm3 = vcmp.lt.s32.totalorder %v216_v54, %v217_v55 }
  0xd5   :  { %v219_v56 = vsel %vm218_vm3, %v216_v54, %v217_v55  ;;  %v303_v54 = vand.u32 127, %v199_v37 }
  0xd6   :  { %v220_v57 = vrot.slane %v219_v56, 1 }
  0xd7   :  { %vm304_vm3 = vcmp.eq.s32.totalorder %v303_v54, 0 }
  0xd8   :  { %vm221_vm4 = vcmp.lt.s32.totalorder %v219_v56, %v220_v57 }
  0xd9   :  { %v222_v58 = vsel %vm221_vm4, %v219_v56, %v220_v57  ;;  %vm308_vm4 = vcmp.eq.s32.totalorder %v303_v54, 1  ;;  %v368_v56 = vsel %vm304_vm3, 1.0, %v383_v40  ;;  %v206_v57 = vpop.xlane.xlu0 %205 }
  0xda   :  { %v223_v59 = vand.u32 4294967288, %v222_v58  ;;  %vm242_vm5 = vcmp.eq.s32.totalorder %v213_v52, %v222_v58  ;;  %v369_v58 = vsel %vm308_vm4, 1.0, %v383_v40 }
  0xdb   :  { %v243_v60 = vsel %vm242_vm5, 2147483647, %v213_v52  ;;  %vm313_vm5 = vcmp.eq.s32.totalorder %v303_v54, 2 }
  0xdc   :  { %v244_v61 = vrot.slane %v243_v60, 4  ;;  %376 = vrsqrt.f32 %v223_v59  ;;  %vm232_vm11 = vcmp.eq.f32.partialorder %v223_v59, inf  ;;  %v235_v15 = vand.u32 2147483648, %v223_v59 }
  0xdd   :  { %vm234_vm12 = vcmp.eq.f32.partialorder %v223_v59, 0.0 }
  0xde   :  { %vm245_vm6 = vcmp.lt.s32.totalorder %v243_v60, %v244_v61 }
  0xdf   :  { %v246_v62 = vsel %vm245_vm6, %v243_v60, %v244_v61  ;;  %vm318_vm6 = vcmp.eq.s32.totalorder %v303_v54, 3 }
  0xe0   :  { %v247_v63 = vrot.slane %v246_v62, 2 }
  0xe2   :  { %v377_v0 = vpop.eup %376  ;;  %vm248_vm7 = vcmp.lt.s32.totalorder %v246_v62, %v247_v63 }
  0xe3   :  { %v249_v1 = vsel %vm248_vm7, %v246_v62, %v247_v63  ;;  %v226_v2 = vmul.f32 %v377_v0, %v223_v59  ;;  %v307_v62 = vmul.f32 %v368_v56, %v206_v57  ;;  %vm323_vm7 = vcmp.eq.s32.totalorder %v303_v54, 4 }
  0xe4   :  { %v250_v3 = vrot.slane %v249_v1, 1 }
  0xe5   :  { %v227_v4 = vmul.f32 %v377_v0, %v226_v2  ;;  %v372_v2 = vsel %vm323_vm7, 1.0, %v383_v40 }
  0xe6   :  { %vm251_vm8 = vcmp.lt.s32.totalorder %v249_v1, %v250_v3 }
  0xe7   :  { %v252_v5 = vsel %vm251_vm8, %v249_v1, %v250_v3  ;;  %v228_v6 = vmul.f32 0.5, %v227_v4 }
  0xe8   :  { %v253_v7 = vand.u32 4294967288, %v252_v5  ;;  %vm272_vm9 = vcmp.eq.s32.totalorder %v243_v60, %v252_v5 }
  0xe9   :  { %v273_v8 = vsel %vm272_vm9, 2147483647, %v243_v60  ;;  %v229_v9 = vsub.f32 1.5, %v228_v6 }
  0xea   :  { %v274_v10 = vrot.slane %v273_v8, 4  ;;  %378 = vrsqrt.f32 %v253_v7  ;;  %vm262_vm15 = vcmp.eq.f32.partialorder %v253_v7, inf  ;;  %v265_v32 = vand.u32 2147483648, %v253_v7 }
  0xeb   :  { %v230_v11 = vmul.f32 %v377_v0, %v229_v9  ;;  %vm264_vm0 = vcmp.eq.f32.partialorder %v253_v7, 0.0 }
  0xec   :  { %vm275_vm10 = vcmp.lt.s32.totalorder %v273_v8, %v274_v10 }
  0xed   :  { %v276_v12 = vsel %vm275_vm10, %v273_v8, %v274_v10  ;;  %v231_v13 = vmul.f32 %v230_v11, %v223_v59 }
  0xee   :  { %v277_v14 = vrot.slane %v276_v12, 2 }
  0xef   :  { %v233_v16 = vsel %vm232_vm11, %v223_v59, %v231_v13  ;;  %v370_v59 = vsel %vm313_vm5, 1.0, %v383_v40 }
  0xf0   :  { %v379_v17 = vpop.eup %378  ;;  %vm278_vm13 = vcmp.lt.s32.totalorder %v276_v12, %v277_v14  ;;  %v236_v18 = vsel %vm234_vm12, %v235_v15, %v233_v16 }
  0xf1   :  { %v279_v19 = vsel %vm278_vm13, %v276_v12, %v277_v14  ;;  %v237_v20 = vsub.f32 5.0, %v236_v18  ;;  %v256_v21 = vmul.f32 %v379_v17, %v253_v7 }
  0xf2   :  { %v280_v22 = vrot.slane %v279_v19, 1 }
  0xf3   :  { %v238_v23 = vmul.f32 %v237_v20, %v237_v20  ;;  %v257_v24 = vmul.f32 %v379_v17, %v256_v21 }
  0xf4   :  { %vm281_vm14 = vcmp.lt.s32.totalorder %v279_v19, %v280_v22 }
  0xf5   :  { %v282_v25 = vsel %vm281_vm14, %v279_v19, %v280_v22  ;;  %v239_v26 = vmul.f32 %v495_v41, %v238_v23  ;;  %v258_v27 = vmul.f32 0.5, %v257_v24 }
  0xf6   :  { %v283_v28 = vand.u32 4294967288, %v282_v25 }
  0xf7   :  { %240 = vadd.xlane.f32.xlu1 %v239_v26  ;;  %v259_v29 = vsub.f32 1.5, %v258_v27 }
  0xf8   :  { %380 = vrsqrt.f32 %v283_v28  ;;  %vm292_vm1 = vcmp.eq.f32.partialorder %v283_v28, inf  ;;  %v295_v48 = vand.u32 2147483648, %v283_v28  ;;  %vm294_vm2 = vcmp.eq.f32.partialorder %v283_v28, 0.0 }
  0xf9   :  { %v260_v30 = vmul.f32 %v379_v17, %v259_v29 }
  0xfb   :  { %v261_v31 = vmul.f32 %v260_v30, %v253_v7 }
  0xfd   :  { %v263_v33 = vsel %vm262_vm15, %v253_v7, %v261_v31 }
  0xfe   :  { %v381_v34 = vpop.eup %380  ;;  %v266_v35 = vsel %vm264_vm0, %v265_v32, %v263_v33 }
  0xff   :  { %v267_v36 = vsub.f32 5.0, %v266_v35  ;;  %v286_v38 = vmul.f32 %v381_v34, %v283_v28 }
 0x101   :  { %v268_v39 = vmul.f32 %v267_v36, %v267_v36  ;;  %v287_v42 = vmul.f32 %v381_v34, %v286_v38 }
 0x103   :  { %v269_v43 = vmul.f32 %v495_v41, %v268_v39  ;;  %v288_v44 = vmul.f32 0.5, %v287_v42 }
 0x105   :  { %270 = vadd.xlane.f32.xlu2 %v269_v43  ;;  %v289_v45 = vsub.f32 1.5, %v288_v44 }
 0x107   :  { %v290_v46 = vmul.f32 %v381_v34, %v289_v45 }
 0x109   :  { %v291_v47 = vmul.f32 %v290_v46, %v283_v28 }
 0x10b   :  { %v293_v49 = vsel %vm292_vm1, %v283_v28, %v291_v47 }
 0x10c   :  { %v296_v50 = vsel %vm294_vm2, %v295_v48, %v293_v49 }
 0x10d   :  { %v297_v51 = vsub.f32 5.0, %v296_v50 }
 0x10f   :  { %v298_v52 = vmul.f32 %v297_v51, %v297_v51 }
 0x111   :  { %v299_v53 = vmul.f32 %v495_v41, %v298_v52  ;;  %v371_v41 = vsel %vm318_vm6, 1.0, %v383_v40 }
 0x113   :  { %300 = vadd.xlane.f32.xlu2 %v299_v53 }
 0x13e   :  { %v209_v55 = vpop.xlane.xlu1 %208 }
 0x13f   :  { %v311_v63 = vmul.f32 %v369_v58, %v209_v55 }
 0x141   :  { %v312_v37 = vadd.f32 %v311_v63, %v307_v62 }
 0x16a   :  { %v241_v60 = vpop.xlane.xlu1 %240 }
 0x16b   :  { %v316_v0 = vmul.f32 %v370_v59, %v241_v60 }
 0x16d   :  { %v317_v3 = vadd.f32 %v316_v0, %v312_v37 }
 0x178   :  { %v271_v61 = vpop.xlane.xlu2 %270 }
 0x179   :  { %v321_v1 = vmul.f32 %v371_v41, %v271_v61 }
 0x17b   :  { %v322_v5 = vadd.f32 %v321_v1, %v317_v3 }
 0x186   :  { %v301_v4 = vpop.xlane.xlu2 %300 }
 0x187   :  { %v326_v6 = vmul.f32 %v372_v2, %v301_v4 }
 0x189   :  { %v327_v7 = vadd.f32 %v326_v6, %v322_v5 }
 0x18b   :  { %328 = vst [vmem:[%s514_s3] sm:$0xff] %v327_v7 }

</bundles_post_ra>
